<compile_context>
chip_gen: v7x
topology: tpu7x:2x2x1
jax: 0.10.0
libtpu: 0.0.40
codegen_flags: <defaults>
</compile_context>

<pallas_src>
import jax
import jax.numpy as jnp
from jax.experimental import pallas as pl
from jax.experimental.pallas import tpu as pltpu

INPUT_SIZE = 1
HIDDEN = 32
OUT_LANES = 128  # merged, lane-dense output width


def rnn_kernel(x_ref, h0_ref, pack_ref, out_ref):
    """Sequential RNN recurrence + per-step output projection.

    x_ref   : (B, T)      input (I == 1, squeezed), batch-major
    h0_ref  : (B, H)      initial hidden state
    pack_ref: (H+8, 128)  packed params:
                rows [0:H],  lanes [0:H] : W_hh^T
                row  H,      lanes [0:H] : W_ih^T (row vector, I == 1)
                row  H+1,    lanes [0:H] : b_ih + b_hh (fused)
                row  H+2,    lanes [0:H] : W_out (row vector)
                row  H+3,    lane  0     : b_out
    out_ref : (B, 128)    lanes [0:T) = y, lanes [T:T+H) = h_T
    """
    B, T = x_ref.shape
    H = h0_ref.shape[1]

    whh = pack_ref[0:H, 0:H]            # (H, H)
    wih = pack_ref[H:H + 1, 0:H]        # (1, H)
    b = pack_ref[H + 1:H + 2, 0:H]      # (1, H)
    wout = pack_ref[H + 2:H + 3, 0:H]   # (1, H)
    bout = pack_ref[H + 3:H + 4, 0:1]   # (1, 1)

    # Deterministic output buffer (single cheap dense vst; unused lanes are
    # sliced away in the wrapper anyway).
    out_ref[...] = jnp.zeros_like(out_ref)

    x = x_ref[...]                      # (B, T)
    h = h0_ref[...]                     # (B, H)

    # Static unroll: per step the serial chain is one (B,H)@(H,H) MXU matmul
    # + add + tanh; the input projection (x-only) and the output projection
    # (doesn't feed the recurrence) overlap with neighbouring steps.
    for t in range(T):
        xw_t = x[:, t:t + 1] * wih + b                                   # (B, H)
        h = jnp.tanh(xw_t + jnp.dot(h, whh,
                                    preferred_element_type=jnp.float32))  # (B, H)
        y_t = jnp.sum(h * wout, axis=-1, keepdims=True) + bout           # (B, 1)
        out_ref[:, t:t + 1] = y_t.astype(out_ref.dtype)

    out_ref[:, T:T + H] = h.astype(out_ref.dtype)


def pack_params(params):
    """Pack all parameters into one (H+8, 128) f32 block (done once at init)."""
    H = params["whh_t"].shape[0]
    pack = jnp.zeros((H + 8, OUT_LANES), jnp.float32)
    pack = pack.at[0:H, 0:H].set(params["whh_t"])
    pack = pack.at[H, 0:H].set(params["wih_t"][0])
    pack = pack.at[H + 1, 0:H].set(params["b_ih"] + params["b_hh"])
    pack = pack.at[H + 2, 0:H].set(params["wout_t"][:, 0])
    pack = pack.at[H + 3, 0].set(params["b_out"][0])
    return pack


def _rnn_forward(x, h_state, param_pack):
    """Equivalent of RNN.forward(x, h_state).

    x         : (B, T, 1) float32 (batch_first, like PyTorch)
    h_state   : (1, B, H) float32 or None
    param_pack: (H+8, 128) from pack_params
    returns   : (outs (B, T, 1), h_state (1, B, H))
    """
    B, T, I = x.shape
    assert I == INPUT_SIZE == 1, "kernel specialises the I == 1 case"
    H = param_pack.shape[0] - 8
    assert T + H <= OUT_LANES, "merged output layout assumes T + H <= 128"

    h0 = jnp.zeros((B, H), x.dtype) if h_state is None else h_state[0]
    x_bt = x[:, :, 0]                                     # (B, T), no transpose

    out = pl.pallas_call(
        rnn_kernel,
        out_shape=jax.ShapeDtypeStruct((B, OUT_LANES), x.dtype),
        in_specs=[pl.BlockSpec(memory_space=pltpu.MemorySpace.VMEM)] * 3,
        out_specs=pl.BlockSpec(memory_space=pltpu.MemorySpace.VMEM),
    )(x_bt, h0, param_pack)

    outs = out[:, :T, None]                               # (B, T, 1)
    h_final = out[:, T:T + H]                             # (B, H)
    return outs, h_final[None]                            # (1, B, H)


rnn_forward = jax.jit(_rnn_forward)


def init_params(key, input_size=INPUT_SIZE, hidden=HIDDEN):
    # Deterministic init mimicking torch's U(-1/sqrt(H), 1/sqrt(H)).
    ks = jax.random.split(key, 6)
    s = 1.0 / jnp.sqrt(hidden)
    return {
        # stored transposed relative to PyTorch (out_features, in_features)
        "wih_t": jax.random.uniform(ks[0], (input_size, hidden), jnp.float32, -s, s),
        "whh_t": jax.random.uniform(ks[1], (hidden, hidden), jnp.float32, -s, s),
        "b_ih": jax.random.uniform(ks[2], (hidden,), jnp.float32, -s, s),
        "b_hh": jax.random.uniform(ks[3], (hidden,), jnp.float32, -s, s),
        "wout_t": jax.random.uniform(ks[4], (hidden, 1), jnp.float32, -s, s),
        "b_out": jax.random.uniform(ks[5], (1,), jnp.float32, -s, s),
    }


def rnn_forward_ref(x, h_state, params):
    """Pure-JAX reference matching PyTorch nn.RNN(tanh) + per-step Linear."""
    B, T, I = x.shape
    H = params["whh_t"].shape[0]
    h = jnp.zeros((B, H), x.dtype) if h_state is None else h_state[0]
    ys = []
    for t in range(T):
        h = jnp.tanh(x[:, t, :] @ params["wih_t"] + h @ params["whh_t"]
                     + params["b_ih"] + params["b_hh"])
        ys.append(h @ params["wout_t"] + params["b_out"])
    return jnp.stack(ys, axis=1), h[None]


if __name__ == "__main__":
    key = jax.random.PRNGKey(0)
    k_p, k_x = jax.random.split(key)

    B, T = 2, 8
    params = init_params(k_p)
    param_pack = pack_params(params)            # built once, reused every call
    x = jax.random.normal(k_x, (B, T, INPUT_SIZE), dtype=jnp.float32)
    h_state = None  # matches `h_state = None` in the PyTorch script

    outs, h_new = rnn_forward(x, h_state, param_pack)
    outs, h_new = jax.block_until_ready((outs, h_new))

    outs_ref, h_ref = rnn_forward_ref(x, h_state, params)
    assert outs.shape == (B, T, 1) and h_new.shape == (1, B, HIDDEN)
    assert jnp.allclose(outs, outs_ref, atol=1e-5, rtol=1e-5)
    assert jnp.allclose(h_new, h_ref, atol=1e-5, rtol=1e-5)

    print("KERNEL_OK")
</pallas_src>

<mosaic_0001>
module attributes {stable_mosaic.version = 11 : i64} {
  func.func @rnn_kernel(%arg0: memref<2x8xf32, #tpu.memory_space<vmem>>, %arg1: memref<2x32xf32, #tpu.memory_space<vmem>>, %arg2: memref<40x128xf32, #tpu.memory_space<vmem>>, %arg3: memref<2x128xf32, #tpu.memory_space<vmem>>) attributes {dimension_semantics = [], scalar_prefetch = 0 : i64, scratch_operands = 0 : i64, tpu.core_type = #tpu.core_type<tc>} {
    %c0 = arith.constant 0 : index
    %c0_0 = arith.constant 0 : index
    %0 = vector.load %arg2[%c0, %c0_0] : memref<40x128xf32, #tpu.memory_space<vmem>>, vector<32x32xf32>
    %c32 = arith.constant 32 : index
    %c0_1 = arith.constant 0 : index
    %1 = vector.load %arg2[%c32, %c0_1] : memref<40x128xf32, #tpu.memory_space<vmem>>, vector<1x32xf32>
    %c33 = arith.constant 33 : index
    %c0_2 = arith.constant 0 : index
    %2 = vector.load %arg2[%c33, %c0_2] : memref<40x128xf32, #tpu.memory_space<vmem>>, vector<1x32xf32>
    %c34 = arith.constant 34 : index
    %c0_3 = arith.constant 0 : index
    %3 = vector.load %arg2[%c34, %c0_3] : memref<40x128xf32, #tpu.memory_space<vmem>>, vector<1x32xf32>
    %c35 = arith.constant 35 : index
    %c0_4 = arith.constant 0 : index
    %4 = vector.load %arg2[%c35, %c0_4] : memref<40x128xf32, #tpu.memory_space<vmem>>, vector<1x1xf32>
    %cst = arith.constant 0.000000e+00 : f32
    %5 = vector.broadcast %cst : f32 to vector<2x128xf32>
    %c0_5 = arith.constant 0 : index
    %c0_6 = arith.constant 0 : index
    %6 = vector.load %arg3[%c0_5, %c0_6] : memref<2x128xf32, #tpu.memory_space<vmem>>, vector<2x128xf32>
    tpu.vector_store %arg3[%c0_5, %c0_6], %5 {strides = array<i32>} : memref<2x128xf32, #tpu.memory_space<vmem>>, vector<2x128xf32>,
    %c0_7 = arith.constant 0 : index
    %c0_8 = arith.constant 0 : index
    %7 = vector.load %arg0[%c0_7, %c0_8] : memref<2x8xf32, #tpu.memory_space<vmem>>, vector<2x8xf32>
    %c0_9 = arith.constant 0 : index
    %c0_10 = arith.constant 0 : index
    %8 = vector.load %arg1[%c0_9, %c0_10] : memref<2x32xf32, #tpu.memory_space<vmem>>, vector<2x32xf32>
    %9 = vector.extract_strided_slice %7 {offsets = [0, 0], sizes = [2, 1], strides = [1, 1]} : vector<2x8xf32> to vector<2x1xf32>
    %10 = vector.broadcast %9 : vector<2x1xf32> to vector<2x32xf32>
    %11 = vector.broadcast %1 : vector<1x32xf32> to vector<2x32xf32>
    %12 = arith.mulf %10, %11 : vector<2x32xf32>
    %13 = vector.broadcast %2 : vector<1x32xf32> to vector<2x32xf32>
    %14 = arith.addf %12, %13 : vector<2x32xf32>
    %cst_11 = arith.constant dense<0.000000e+00> : vector<2x32xf32>
    %15 = tpu.matmul %8, %0, %cst_11 {dimension_numbers = #tpu.dot_dimension_numbers<[1], [0], [0], [1], [0, 0, 1, 1], [], []>} : vector<2x32xf32>, vector<32x32xf32>, vector<2x32xf32> -> vector<2x32xf32>
    %16 = arith.addf %14, %15 : vector<2x32xf32>
    %17 = math.tanh %16 : vector<2x32xf32>
    %18 = vector.broadcast %3 : vector<1x32xf32> to vector<2x32xf32>
    %19 = arith.mulf %17, %18 : vector<2x32xf32>
    %cst_12 = arith.constant dense<0.000000e+00> : vector<2xf32>
    %20 = vector.multi_reduction <add>, %19, %cst_12 [1] : vector<2x32xf32> to vector<2xf32>
    %21 = vector.shape_cast %20 : vector<2xf32> to vector<2x1xf32>
    %22 = vector.broadcast %4 : vector<1x1xf32> to vector<2x1xf32>
    %23 = arith.addf %21, %22 : vector<2x1xf32>
    %c0_13 = arith.constant 0 : index
    %c0_14 = arith.constant 0 : index
    %24 = vector.load %arg3[%c0_13, %c0_14] : memref<2x128xf32, #tpu.memory_space<vmem>>, vector<2x1xf32>
    tpu.vector_store %arg3[%c0_13, %c0_14], %23 {strides = array<i32>} : memref<2x128xf32, #tpu.memory_space<vmem>>, vector<2x1xf32>,
    %25 = vector.extract_strided_slice %7 {offsets = [0, 1], sizes = [2, 1], strides = [1, 1]} : vector<2x8xf32> to vector<2x1xf32>
    %26 = vector.broadcast %25 : vector<2x1xf32> to vector<2x32xf32>
    %27 = vector.broadcast %1 : vector<1x32xf32> to vector<2x32xf32>
    %28 = arith.mulf %26, %27 : vector<2x32xf32>
    %29 = vector.broadcast %2 : vector<1x32xf32> to vector<2x32xf32>
    %30 = arith.addf %28, %29 : vector<2x32xf32>
    %cst_15 = arith.constant dense<0.000000e+00> : vector<2x32xf32>
    %31 = tpu.matmul %17, %0, %cst_15 {dimension_numbers = #tpu.dot_dimension_numbers<[1], [0], [0], [1], [0, 0, 1, 1], [], []>} : vector<2x32xf32>, vector<32x32xf32>, vector<2x32xf32> -> vector<2x32xf32>
    %32 = arith.addf %30, %31 : vector<2x32xf32>
    %33 = math.tanh %32 : vector<2x32xf32>
    %34 = vector.broadcast %3 : vector<1x32xf32> to vector<2x32xf32>
    %35 = arith.mulf %33, %34 : vector<2x32xf32>
    %cst_16 = arith.constant dense<0.000000e+00> : vector<2xf32>
    %36 = vector.multi_reduction <add>, %35, %cst_16 [1] : vector<2x32xf32> to vector<2xf32>
    %37 = vector.shape_cast %36 : vector<2xf32> to vector<2x1xf32>
    %38 = vector.broadcast %4 : vector<1x1xf32> to vector<2x1xf32>
    %39 = arith.addf %37, %38 : vector<2x1xf32>
    %c0_17 = arith.constant 0 : index
    %c1 = arith.constant 1 : index
    %40 = vector.load %arg3[%c0_17, %c1] : memref<2x128xf32, #tpu.memory_space<vmem>>, vector<2x1xf32>
    tpu.vector_store %arg3[%c0_17, %c1], %39 {strides = array<i32>} : memref<2x128xf32, #tpu.memory_space<vmem>>, vector<2x1xf32>,
    %41 = vector.extract_strided_slice %7 {offsets = [0, 2], sizes = [2, 1], strides = [1, 1]} : vector<2x8xf32> to vector<2x1xf32>
    %42 = vector.broadcast %41 : vector<2x1xf32> to vector<2x32xf32>
    %43 = vector.broadcast %1 : vector<1x32xf32> to vector<2x32xf32>
    %44 = arith.mulf %42, %43 : vector<2x32xf32>
    %45 = vector.broadcast %2 : vector<1x32xf32> to vector<2x32xf32>
    %46 = arith.addf %44, %45 : vector<2x32xf32>
    %cst_18 = arith.constant dense<0.000000e+00> : vector<2x32xf32>
    %47 = tpu.matmul %33, %0, %cst_18 {dimension_numbers = #tpu.dot_dimension_numbers<[1], [0], [0], [1], [0, 0, 1, 1], [], []>} : vector<2x32xf32>, vector<32x32xf32>, vector<2x32xf32> -> vector<2x32xf32>
    %48 = arith.addf %46, %47 : vector<2x32xf32>
    %49 = math.tanh %48 : vector<2x32xf32>
    %50 = vector.broadcast %3 : vector<1x32xf32> to vector<2x32xf32>
    %51 = arith.mulf %49, %50 : vector<2x32xf32>
    %cst_19 = arith.constant dense<0.000000e+00> : vector<2xf32>
    %52 = vector.multi_reduction <add>, %51, %cst_19 [1] : vector<2x32xf32> to vector<2xf32>
    %53 = vector.shape_cast %52 : vector<2xf32> to vector<2x1xf32>
    %54 = vector.broadcast %4 : vector<1x1xf32> to vector<2x1xf32>
    %55 = arith.addf %53, %54 : vector<2x1xf32>
    %c0_20 = arith.constant 0 : index
    %c2 = arith.constant 2 : index
    %56 = vector.load %arg3[%c0_20, %c2] : memref<2x128xf32, #tpu.memory_space<vmem>>, vector<2x1xf32>
    tpu.vector_store %arg3[%c0_20, %c2], %55 {strides = array<i32>} : memref<2x128xf32, #tpu.memory_space<vmem>>, vector<2x1xf32>,
    %57 = vector.extract_strided_slice %7 {offsets = [0, 3], sizes = [2, 1], strides = [1, 1]} : vector<2x8xf32> to vector<2x1xf32>
    %58 = vector.broadcast %57 : vector<2x1xf32> to vector<2x32xf32>
    %59 = vector.broadcast %1 : vector<1x32xf32> to vector<2x32xf32>
    %60 = arith.mulf %58, %59 : vector<2x32xf32>
    %61 = vector.broadcast %2 : vector<1x32xf32> to vector<2x32xf32>
    %62 = arith.addf %60, %61 : vector<2x32xf32>
    %cst_21 = arith.constant dense<0.000000e+00> : vector<2x32xf32>
    %63 = tpu.matmul %49, %0, %cst_21 {dimension_numbers = #tpu.dot_dimension_numbers<[1], [0], [0], [1], [0, 0, 1, 1], [], []>} : vector<2x32xf32>, vector<32x32xf32>, vector<2x32xf32> -> vector<2x32xf32>
    %64 = arith.addf %62, %63 : vector<2x32xf32>
    %65 = math.tanh %64 : vector<2x32xf32>
    %66 = vector.broadcast %3 : vector<1x32xf32> to vector<2x32xf32>
    %67 = arith.mulf %65, %66 : vector<2x32xf32>
    %cst_22 = arith.constant dense<0.000000e+00> : vector<2xf32>
    %68 = vector.multi_reduction <add>, %67, %cst_22 [1] : vector<2x32xf32> to vector<2xf32>
    %69 = vector.shape_cast %68 : vector<2xf32> to vector<2x1xf32>
    %70 = vector.broadcast %4 : vector<1x1xf32> to vector<2x1xf32>
    %71 = arith.addf %69, %70 : vector<2x1xf32>
    %c0_23 = arith.constant 0 : index
    %c3 = arith.constant 3 : index
    %72 = vector.load %arg3[%c0_23, %c3] : memref<2x128xf32, #tpu.memory_space<vmem>>, vector<2x1xf32>
    tpu.vector_store %arg3[%c0_23, %c3], %71 {strides = array<i32>} : memref<2x128xf32, #tpu.memory_space<vmem>>, vector<2x1xf32>,
    %73 = vector.extract_strided_slice %7 {offsets = [0, 4], sizes = [2, 1], strides = [1, 1]} : vector<2x8xf32> to vector<2x1xf32>
    %74 = vector.broadcast %73 : vector<2x1xf32> to vector<2x32xf32>
    %75 = vector.broadcast %1 : vector<1x32xf32> to vector<2x32xf32>
    %76 = arith.mulf %74, %75 : vector<2x32xf32>
    %77 = vector.broadcast %2 : vector<1x32xf32> to vector<2x32xf32>
    %78 = arith.addf %76, %77 : vector<2x32xf32>
    %cst_24 = arith.constant dense<0.000000e+00> : vector<2x32xf32>
    %79 = tpu.matmul %65, %0, %cst_24 {dimension_numbers = #tpu.dot_dimension_numbers<[1], [0], [0], [1], [0, 0, 1, 1], [], []>} : vector<2x32xf32>, vector<32x32xf32>, vector<2x32xf32> -> vector<2x32xf32>
    %80 = arith.addf %78, %79 : vector<2x32xf32>
    %81 = math.tanh %80 : vector<2x32xf32>
    %82 = vector.broadcast %3 : vector<1x32xf32> to vector<2x32xf32>
    %83 = arith.mulf %81, %82 : vector<2x32xf32>
    %cst_25 = arith.constant dense<0.000000e+00> : vector<2xf32>
    %84 = vector.multi_reduction <add>, %83, %cst_25 [1] : vector<2x32xf32> to vector<2xf32>
    %85 = vector.shape_cast %84 : vector<2xf32> to vector<2x1xf32>
    %86 = vector.broadcast %4 : vector<1x1xf32> to vector<2x1xf32>
    %87 = arith.addf %85, %86 : vector<2x1xf32>
    %c0_26 = arith.constant 0 : index
    %c4 = arith.constant 4 : index
    %88 = vector.load %arg3[%c0_26, %c4] : memref<2x128xf32, #tpu.memory_space<vmem>>, vector<2x1xf32>
    tpu.vector_store %arg3[%c0_26, %c4], %87 {strides = array<i32>} : memref<2x128xf32, #tpu.memory_space<vmem>>, vector<2x1xf32>,
    %89 = vector.extract_strided_slice %7 {offsets = [0, 5], sizes = [2, 1], strides = [1, 1]} : vector<2x8xf32> to vector<2x1xf32>
    %90 = vector.broadcast %89 : vector<2x1xf32> to vector<2x32xf32>
    %91 = vector.broadcast %1 : vector<1x32xf32> to vector<2x32xf32>
    %92 = arith.mulf %90, %91 : vector<2x32xf32>
    %93 = vector.broadcast %2 : vector<1x32xf32> to vector<2x32xf32>
    %94 = arith.addf %92, %93 : vector<2x32xf32>
    %cst_27 = arith.constant dense<0.000000e+00> : vector<2x32xf32>
    %95 = tpu.matmul %81, %0, %cst_27 {dimension_numbers = #tpu.dot_dimension_numbers<[1], [0], [0], [1], [0, 0, 1, 1], [], []>} : vector<2x32xf32>, vector<32x32xf32>, vector<2x32xf32> -> vector<2x32xf32>
    %96 = arith.addf %94, %95 : vector<2x32xf32>
    %97 = math.tanh %96 : vector<2x32xf32>
    %98 = vector.broadcast %3 : vector<1x32xf32> to vector<2x32xf32>
    %99 = arith.mulf %97, %98 : vector<2x32xf32>
    %cst_28 = arith.constant dense<0.000000e+00> : vector<2xf32>
    %100 = vector.multi_reduction <add>, %99, %cst_28 [1] : vector<2x32xf32> to vector<2xf32>
    %101 = vector.shape_cast %100 : vector<2xf32> to vector<2x1xf32>
    %102 = vector.broadcast %4 : vector<1x1xf32> to vector<2x1xf32>
    %103 = arith.addf %101, %102 : vector<2x1xf32>
    %c0_29 = arith.constant 0 : index
    %c5 = arith.constant 5 : index
    %104 = vector.load %arg3[%c0_29, %c5] : memref<2x128xf32, #tpu.memory_space<vmem>>, vector<2x1xf32>
    tpu.vector_store %arg3[%c0_29, %c5], %103 {strides = array<i32>} : memref<2x128xf32, #tpu.memory_space<vmem>>, vector<2x1xf32>,
    %105 = vector.extract_strided_slice %7 {offsets = [0, 6], sizes = [2, 1], strides = [1, 1]} : vector<2x8xf32> to vector<2x1xf32>
    %106 = vector.broadcast %105 : vector<2x1xf32> to vector<2x32xf32>
    %107 = vector.broadcast %1 : vector<1x32xf32> to vector<2x32xf32>
    %108 = arith.mulf %106, %107 : vector<2x32xf32>
    %109 = vector.broadcast %2 : vector<1x32xf32> to vector<2x32xf32>
    %110 = arith.addf %108, %109 : vector<2x32xf32>
    %cst_30 = arith.constant dense<0.000000e+00> : vector<2x32xf32>
    %111 = tpu.matmul %97, %0, %cst_30 {dimension_numbers = #tpu.dot_dimension_numbers<[1], [0], [0], [1], [0, 0, 1, 1], [], []>} : vector<2x32xf32>, vector<32x32xf32>, vector<2x32xf32> -> vector<2x32xf32>
    %112 = arith.addf %110, %111 : vector<2x32xf32>
    %113 = math.tanh %112 : vector<2x32xf32>
    %114 = vector.broadcast %3 : vector<1x32xf32> to vector<2x32xf32>
    %115 = arith.mulf %113, %114 : vector<2x32xf32>
    %cst_31 = arith.constant dense<0.000000e+00> : vector<2xf32>
    %116 = vector.multi_reduction <add>, %115, %cst_31 [1] : vector<2x32xf32> to vector<2xf32>
    %117 = vector.shape_cast %116 : vector<2xf32> to vector<2x1xf32>
    %118 = vector.broadcast %4 : vector<1x1xf32> to vector<2x1xf32>
    %119 = arith.addf %117, %118 : vector<2x1xf32>
    %c0_32 = arith.constant 0 : index
    %c6 = arith.constant 6 : index
    %120 = vector.load %arg3[%c0_32, %c6] : memref<2x128xf32, #tpu.memory_space<vmem>>, vector<2x1xf32>
    tpu.vector_store %arg3[%c0_32, %c6], %119 {strides = array<i32>} : memref<2x128xf32, #tpu.memory_space<vmem>>, vector<2x1xf32>,
    %121 = vector.extract_strided_slice %7 {offsets = [0, 7], sizes = [2, 1], strides = [1, 1]} : vector<2x8xf32> to vector<2x1xf32>
    %122 = vector.broadcast %121 : vector<2x1xf32> to vector<2x32xf32>
    %123 = vector.broadcast %1 : vector<1x32xf32> to vector<2x32xf32>
    %124 = arith.mulf %122, %123 : vector<2x32xf32>
    %125 = vector.broadcast %2 : vector<1x32xf32> to vector<2x32xf32>
    %126 = arith.addf %124, %125 : vector<2x32xf32>
    %cst_33 = arith.constant dense<0.000000e+00> : vector<2x32xf32>
    %127 = tpu.matmul %113, %0, %cst_33 {dimension_numbers = #tpu.dot_dimension_numbers<[1], [0], [0], [1], [0, 0, 1, 1], [], []>} : vector<2x32xf32>, vector<32x32xf32>, vector<2x32xf32> -> vector<2x32xf32>
    %128 = arith.addf %126, %127 : vector<2x32xf32>
    %129 = math.tanh %128 : vector<2x32xf32>
    %130 = vector.broadcast %3 : vector<1x32xf32> to vector<2x32xf32>
    %131 = arith.mulf %129, %130 : vector<2x32xf32>
    %cst_34 = arith.constant dense<0.000000e+00> : vector<2xf32>
    %132 = vector.multi_reduction <add>, %131, %cst_34 [1] : vector<2x32xf32> to vector<2xf32>
    %133 = vector.shape_cast %132 : vector<2xf32> to vector<2x1xf32>
    %134 = vector.broadcast %4 : vector<1x1xf32> to vector<2x1xf32>
    %135 = arith.addf %133, %134 : vector<2x1xf32>
    %c0_35 = arith.constant 0 : index
    %c7 = arith.constant 7 : index
    %136 = vector.load %arg3[%c0_35, %c7] : memref<2x128xf32, #tpu.memory_space<vmem>>, vector<2x1xf32>
    tpu.vector_store %arg3[%c0_35, %c7], %135 {strides = array<i32>} : memref<2x128xf32, #tpu.memory_space<vmem>>, vector<2x1xf32>,
    %c0_36 = arith.constant 0 : index
    %c8 = arith.constant 8 : index
    %137 = vector.load %arg3[%c0_36, %c8] : memref<2x128xf32, #tpu.memory_space<vmem>>, vector<2x32xf32>
    tpu.vector_store %arg3[%c0_36, %c8], %129 {strides = array<i32>} : memref<2x128xf32, #tpu.memory_space<vmem>>, vector<2x32xf32>,
    return
  }
}

</mosaic_0001>

<bundles_post_ra>
// kernel: _rnn_forward.1
= control target key start
LH: loop header
LB: loop body
LE: loop exit
PB: predicated region body
PF: predicated region fallthrough
CT: control target
= control target key end

     0   :  { %8 = vsyncpa [#allocation3], 0  ;;  %s1058_s12 = smov [#allocation2]   ;;  %s1270_s0 = inlined_call_operand.vmem [shape: f32[2,8], index: 0, kind: input, shape index: {}]   ;;  %s1271_s1 = inlined_call_operand.vmem [shape: f32[2,32], index: 1, kind: input, shape index: {}]   ;;  %s1272_s2 = inlined_call_operand.hbm [shape: f32[40,128], index: 2, kind: input, shape index: {}]   ;;  %s1273_s3 = inlined_call_operand.vmem [shape: f32[2,128], index: 3, kind: output, shape index: {}]  }
   0x1   :  { %s18_s13 = sshll.u32 %s1058_s12, 4  ;;  %s1034_s16 = scalar_lea.hbm %s1272_s2, 640  ;;  %s19_s13 = int_to_ptr.vmem [resolvable:$true] %s18_s13 }
   0x2   :  { %p1035_p0 = scmp.ne.s32.totalorder %s1272_s2, %s1034_s16  ;;  %p1038_p1 = scmp.lt.u32.totalorder %s1034_s16, %s1272_s2 }
   0x4   :  { %p1040_p2 = pnand %p1038_p1, %p1035_p0 }
   0x6   :  { %1043 = shalt.err (!%p1040_p2)
}
   0x7   :  { %s1044_s21 = scalar_lea.vmem %s19_s13, 640  ;;  %p1049_p4 = scmp.lt.s32.totalorder %s19_s13, %s19_s13 }
   0x8   :  { %p1045_p3 = scmp.ne.s32.totalorder %s19_s13, %s1044_s21  ;;  %p1050_p5 = scmp.lt.s32.totalorder %s1044_s21, %s1044_s21 }
   0xa   :  { %p1051_p6 = por %p1050_p5, %p1049_p4 }
   0xc   :  { %p1052_p7 = pnand %p1051_p6, %p1045_p3 }
   0xe   :  { %1055 = shalt.err (!%p1052_p7)
}
   0xf   :  { %s1059_s22 = smov 128   ;;  %s1060_s23 = smov 8  }
  0x10   :  { %24 = dma.hbm_to_vmem [thread:$0]  %s1272_s2, 640, %s19_s13, [#allocation3], %s1059_s22, %s1059_s22, %s1060_s23  }
  0x11   :  { %1056 = dma.done.wait [#allocation3], 640  }
  0x12   :  { %1057 = vsyncadd [#allocation3], 4294966656  ;;  %v1061_v0 = vmov 0.0|0.0   ;;  %vm1062_vm0 = vmmov 0   ;;  %v1063_v1 = vmov 0.0   ;;  %v1064_v2 = vmov 0  }
  0x13   :  { %941 = vmatprep.subr.bf16.mxu0 %v1061_v0  ;;  %861 = vmatprep.mubr.msk.f32.mxu0 %vm1062_vm0, %v1063_v1  ;;  %36 = vst [vmem:[%s1273_s3] sm:$0x3] %v1063_v1  ;;  %v1065_v3 = vmov 2   ;;  %v28_v4 = vld [vmem:[#allocation2] sm:$0xff]  ;;  %v29_v5 = vld [vmem:[#allocation2 + $0x8] sm:$0xff]  ;;  %v30_v6 = vld [vmem:[#allocation2 + $0x10] sm:$0xff]  ;;  %v1066_v11 = vmov 3  }
  0x14   :  { %1010 = vset.pattern.permute.xlu0 %v1064_v2  ;;  %1012 = vset.pattern.permute.xlu1 %v1065_v3  ;;  %v1122_v7 = vpack.c.bf16 %v29_v5, %v28_v4  ;;  %v31_v8 = vld [vmem:[#allocation2 + $0x18] sm:$0xff]  ;;  %v37_v9 = vld [vmem:[%s1270_s0] sm:$0x3]  ;;  %vm54_vm1 = vcmask 261120   ;;  %v1067_v13 = vmov 4   ;;  %v1068_v14 = vmov 6  }
  0x15   :  { %947 = vmatprep.subr.bf16.mxu1 %v1061_v0  ;;  %872 = vmatprep.mubr.msk.f32.mxu1 %vm1062_vm0, %v1063_v1  ;;  %v1128_v10 = vpack.c.bf16 %v31_v8, %v30_v6  ;;  %v38_v12 = vld [vmem:[%s1271_s1] sm:$0x3]  ;;  %v1069_v15 = vmov 1   ;;  %v1153_v24 = vld [vmem:[#allocation2 + $0x22] ss:$0 sm:$0xff]  ;;  %vm135_vm2 = vcmask 254976  }
  0x16   :  { %41 = vperm.xlu0 %1010, %v37_v9   ;;  %239 = vperm.xlu1 %1012, %v37_v9   ;;  %v1147_v17 = vld [vmem:[#allocation2 + $0x20] ss:$0 sm:$0xff]  ;;  %v1150_v19 = vld [vmem:[#allocation2 + $0x21] ss:$0 sm:$0xff]  ;;  %v1070_v28 = vmov 5   ;;  %v1071_v29 = vmov 7  }
  0x17   :  { %943 = vmatpush3.bf16.msra.mxu0 %v1122_v7  ;;  %949 = vmatpush3.bf16.msra.mxu1 %v1122_v7  ;;  %v1168_v34 = vld [vmem:[#allocation2 + $0x23] ss:$0 sm:$0xff]  ;;  %vm144_vm3 = vcmask 1024   ;;  %s1072_s4 = smov 1   ;;  %vm236_vm4 = vcmask 9224   ;;  %s1073_s7 = smov 2  }
  0x18   :  { %944 = vmatprep.subr.bf16.mxu0 %v1061_v0  ;;  %950 = vmatprep.subr.bf16.mxu1 %v1061_v0  ;;  %vm328_vm5 = vcmask 17424   ;;  %s1074_s10 = smov 3   ;;  %vm420_vm6 = vcmask 25624   ;;  %s1075_s13 = smov 6   ;;  %vm512_vm7 = vcmask 33824   ;;  %vm604_vm8 = vcmask 42024  }
  0x19   :  { %s1076_s14 = smov 4   ;;  %s1077_s15 = smov 5   ;;  %vm696_vm9 = vcmask 50224   ;;  %vm788_vm10 = vcmask 58424   ;;  %vm794_vm11 = vcmask 320576  }
  0x1a   :  { %1013 = vset.pattern.permute.xlu1 %v1066_v11  ;;  %1011 = vset.pattern.permute.xlu0 %v1069_v15  ;;  %s1078_s16 = smov 7  }
  0x1b   :  { %946 = vmatpush3.bf16.msra.mxu0 %v1128_v10  ;;  %331 = vperm.xlu1 %1013, %v37_v9  }
  0x1c   :  { %952 = vmatpush3.bf16.msra.mxu1 %v1128_v10  ;;  %953 = vmatprep.subr.bf16.mxu0 %v1061_v0 }
  0x1d   :  { %959 = vmatprep.subr.bf16.mxu1 %v1061_v0  ;;  %147 = vperm.xlu0 %1011, %v37_v9  }
  0x1e   :  { %862 = vmatmul.mubr.msk.f32.vlgmr.msra.gmra.mrb[0].mxu0 %vm54_vm1, %v38_v12 }
  0x1f   :  { %1014 = vset.pattern.permute.xlu1 %v1067_v13  ;;  %955 = vmatpush3.bf16.msra.mxu0 %v1122_v7 }
  0x20   :  { %423 = vperm.xlu1 %1014, %v37_v9   ;;  %956 = vmatprep.subr.bf16.mxu0 %v1061_v0 }
  0x21   :  { %883 = vmatprep.mubr.msk.f32.mxu0 %vm1062_vm0, %v1063_v1  ;;  %1015 = vset.pattern.permute.xlu0 %v1070_v28 }
  0x22   :  { %515 = vperm.xlu0 %1015, %v37_v9  }
  0x23   :  { %958 = vmatpush3.bf16.msra.mxu0 %v1128_v10 }
  0x24   :  { %1016 = vset.pattern.permute.xlu1 %v1068_v14  ;;  %965 = vmatprep.subr.bf16.mxu0 %v1061_v0 }
  0x25   :  { %607 = vperm.xlu1 %1016, %v37_v9  }
  0x26   :  { %1017 = vset.pattern.permute.xlu0 %v1071_v29 }
  0x27   :  { %699 = vperm.xlu0 %1017, %v37_v9  }
  0x95   :  { %v42_v16 = vpop.permute.xlu0 %41  ;;  %v240_v30 = vpop.permute.xlu1 %239 }
  0x96   :  { %v48_v18 = vmul.f32 %v1147_v17, %v42_v16  ;;  %v242_v50 = vmul.f32 %v1147_v17, %v240_v30 }
  0x98   :  { %v53_v20 = vadd.f32 %v1150_v19, %v48_v18  ;;  %v243_v51 = vadd.f32 %v1150_v19, %v242_v50 }
  0x9a   :  { %v332_v31 = vpop.permute.xlu1 %331 }
  0x9b   :  { %v334_v61 = vmul.f32 %v1147_v17, %v332_v31 }
  0x9c   :  { %v148_v37 = vpop.permute.xlu0 %147 }
  0x9d   :  { %v150_v38 = vmul.f32 %v1147_v17, %v148_v37  ;;  %v335_v62 = vadd.f32 %v1150_v19, %v334_v61 }
  0x9f   :  { %v1164_v32 = vpop.permute.xlu1 %423  ;;  %v151_v39 = vadd.f32 %v1150_v19, %v150_v38 }
  0xa0   :  { %v426_v9 = vmul.f32 %v1147_v17, %v1164_v32 }
  0xa1   :  { %v1185_v46 = vpop.permute.xlu0 %515 }
  0xa2   :  { %v427_v11 = vadd.f32 %v1150_v19, %v426_v9 }
  0xa4   :  { %v1166_v33 = vpop.permute.xlu1 %607 }
  0xa5   :  { %v610_v29 = vmul.f32 %v1147_v17, %v1166_v33 }
  0xa6   :  { %v1187_v47 = vpop.permute.xlu0 %699 }
  0xa7   :  { %v611_v30 = vadd.f32 %v1150_v19, %v610_v29  ;;  %v702_v33 = vmul.f32 %v1147_v17, %v1187_v47 }
  0xf1   :  { %v124_v21 = vpop.f32.mrb[0].mxu0 }
  0xf2   :  { %v128_v22 = vadd.f32 %v124_v21, %v53_v20  ;;  %v863_v23 = vpop.f32.mrb[1].mxu0 }
  0xf4   :  { %1018 = vtanh.f32 %v128_v22 }
  0xfe   :  { %v1019_v25 = vpop.eup %1018 }
  0xff   :  { %873 = vmatmul.mubr.msk.f32.vlgmr.msra.gmra.mrb[0].mxu1 %vm54_vm1, %v1019_v25  ;;  %v134_v26 = vmul.f32 %v1019_v25, %v1153_v24 }
 0x100   :  { %961 = vmatpush3.bf16.msra.mxu1 %v1122_v7  ;;  %894 = vmatprep.mubr.msk.f32.mxu1 %vm1062_vm0, %v1063_v1 }
 0x101   :  { %v136_v27 = vsel %vm135_vm2, %v134_v26, 0.0  ;;  %962 = vmatprep.subr.bf16.mxu1 %v1061_v0 }
 0x102   :  { %137 = vadd.xlane.f32.xlu1 %v136_v27 }
 0x104   :  { %964 = vmatpush3.bf16.msra.mxu1 %v1128_v10 }
 0x105   :  { %971 = vmatprep.subr.bf16.mxu1 %v1061_v0 }
 0x18f   :  { %v138_v35 = vpop.xlane.xlu1 %137 }
 0x190   :  { %v143_v36 = vadd.f32 %v1168_v34, %v138_v35 }
 0x192   :  { %145 = vst.msk [vmem:[%s1273_s3] sm:$0x3] %vm144_vm3, %v143_v36 }
 0x1d2   :  { %v221_v40 = vpop.f32.mrb[0].mxu1 }
 0x1d3   :  { %v225_v41 = vadd.f32 %v221_v40, %v151_v39  ;;  %v874_v42 = vpop.f32.mrb[1].mxu1 }
 0x1d4   :  { %v703_v42 = vadd.f32 %v1150_v19, %v702_v33 }
 0x1d5   :  { %1020 = vtanh.f32 %v225_v41 }
 0x1df   :  { %v1021_v43 = vpop.eup %1020 }
 0x1e0   :  { %884 = vmatmul.mubr.msk.f32.vlgmr.msra.gmra.mrb[2].mxu0 %vm54_vm1, %v1021_v43  ;;  %v227_v44 = vmul.f32 %v1021_v43, %v1153_v24 }
 0x1e1   :  { %967 = vmatpush3.bf16.msra.mxu0 %v1122_v7  ;;  %905 = vmatprep.mubr.msk.f32.mxu0 %vm1062_vm0, %v1063_v1 }
 0x1e2   :  { %v228_v45 = vsel %vm135_vm2, %v227_v44, 0.0  ;;  %968 = vmatprep.subr.bf16.mxu0 %v1061_v0 }
 0x1e3   :  { %229 = vadd.xlane.f32.xlu0 %v228_v45 }
 0x1e5   :  { %970 = vmatpush3.bf16.msra.mxu0 %v1128_v10 }
 0x1e6   :  { %977 = vmatprep.subr.bf16.mxu0 %v1061_v0 }
 0x270   :  { %v230_v48 = vpop.xlane.xlu0 %229 }
 0x271   :  { %v231_v49 = vadd.f32 %v1168_v34, %v230_v48 }
 0x273   :  { %233 = vrot.lane.b32.xlu1 %v231_v49, %s1072_s4 }
 0x2b3   :  { %v313_v52 = vpop.f32.mrb[2].mxu0 }
 0x2b4   :  { %v317_v53 = vadd.f32 %v313_v52, %v243_v51  ;;  %v885_v54 = vpop.f32.mrb[3].mxu0 }
 0x2b6   :  { %1022 = vtanh.f32 %v317_v53 }
 0x2c0   :  { %v1023_v55 = vpop.eup %1022 }
 0x2c1   :  { %895 = vmatmul.mubr.msk.f32.vlgmr.msra.gmra.mrb[2].mxu1 %vm54_vm1, %v1023_v55  ;;  %v319_v56 = vmul.f32 %v1023_v55, %v1153_v24 }
 0x2c2   :  { %973 = vmatpush3.bf16.msra.mxu1 %v1122_v7  ;;  %916 = vmatprep.mubr.msk.f32.mxu1 %vm1062_vm0, %v1063_v1 }
 0x2c3   :  { %v320_v57 = vsel %vm135_vm2, %v319_v56, 0.0  ;;  %974 = vmatprep.subr.bf16.mxu1 %v1061_v0 }
 0x2c4   :  { %321 = vadd.xlane.f32.xlu0 %v320_v57 }
 0x2c6   :  { %976 = vmatpush3.bf16.msra.mxu1 %v1128_v10 }
 0x2c7   :  { %983 = vmatprep.subr.bf16.mxu1 %v1061_v0 }
 0x2e5   :  { %v234_v58 = vpop.permute.xlu1 %233 }
 0x2e6   :  { %237 = vst.msk [vmem:[%s1273_s3] sm:$0x3] %vm236_vm4, %v234_v58 }
 0x351   :  { %v322_v59 = vpop.xlane.xlu0 %321 }
 0x352   :  { %v323_v60 = vadd.f32 %v1168_v34, %v322_v59 }
 0x354   :  { %325 = vrot.lane.b32.xlu0 %v323_v60, %s1073_s7 }
 0x394   :  { %v405_v63 = vpop.f32.mrb[2].mxu1 }
 0x395   :  { %v409_v2 = vadd.f32 %v405_v63, %v335_v62  ;;  %v896_v3 = vpop.f32.mrb[3].mxu1 }
 0x397   :  { %1024 = vtanh.f32 %v409_v2 }
 0x3a1   :  { %v1025_v4 = vpop.eup %1024 }
 0x3a2   :  { %906 = vmatmul.mubr.msk.f32.vlgmr.msra.gmra.mrb[4].mxu0 %vm54_vm1, %v1025_v4  ;;  %v411_v5 = vmul.f32 %v1025_v4, %v1153_v24 }
 0x3a3   :  { %979 = vmatpush3.bf16.msra.mxu0 %v1122_v7  ;;  %927 = vmatprep.mubr.msk.f32.mxu0 %vm1062_vm0, %v1063_v1 }
 0x3a4   :  { %v412_v6 = vsel %vm135_vm2, %v411_v5, 0.0  ;;  %980 = vmatprep.subr.bf16.mxu0 %v1061_v0 }
 0x3a5   :  { %413 = vadd.xlane.f32.xlu1 %v412_v6 }
 0x3a7   :  { %982 = vmatpush3.bf16.msra.mxu0 %v1128_v10 }
 0x3c6   :  { %v326_v8 = vpop.permute.xlu0 %325 }
 0x3c7   :  { %329 = vst.msk [vmem:[%s1273_s3] sm:$0x3] %vm328_vm5, %v326_v8 }
 0x432   :  { %v414_v20 = vpop.xlane.xlu1 %413 }
 0x433   :  { %v415_v21 = vadd.f32 %v1168_v34, %v414_v20 }
 0x475   :  { %v497_v12 = vpop.f32.mrb[4].mxu0 }
 0x476   :  { %v501_v13 = vadd.f32 %v497_v12, %v427_v11  ;;  %v907_v14 = vpop.f32.mrb[5].mxu0 }
 0x478   :  { %1026 = vtanh.f32 %v501_v13 }
 0x482   :  { %v1027_v15 = vpop.eup %1026 }
 0x483   :  { %917 = vmatmul.mubr.msk.f32.vlgmr.msra.gmra.mrb[4].mxu1 %vm54_vm1, %v1027_v15  ;;  %v503_v16 = vmul.f32 %v1027_v15, %v1153_v24 }
 0x484   :  { %985 = vmatpush3.bf16.msra.mxu1 %v1122_v7  ;;  %938 = vmatprep.mubr.msk.f32.mxu1 %vm1062_vm0, %v1063_v1  ;;  %v518_v1 = vmul.f32 %v1147_v17, %v1185_v46 }
 0x485   :  { %v504_v18 = vsel %vm135_vm2, %v503_v16, 0.0  ;;  %986 = vmatprep.subr.bf16.mxu1 %v1061_v0 }
 0x486   :  { %505 = vadd.xlane.f32.xlu0 %v504_v18  ;;  %v519_v0 = vadd.f32 %v1150_v19, %v518_v1 }
 0x488   :  { %988 = vmatpush3.bf16.msra.mxu1 %v1128_v10 }
 0x49c   :  { %417 = vrot.lane.b32.xlu0 %v415_v21, %s1074_s10 }
 0x513   :  { %v506_v22 = vpop.xlane.xlu0 %505 }
 0x514   :  { %v507_v50 = vadd.f32 %v1168_v34, %v506_v22 }
 0x517   :  { %v418_v23 = vpop.permute.xlu0 %417 }
 0x518   :  { %421 = vst.msk [vmem:[%s1273_s3] sm:$0x3] %vm420_vm6, %v418_v23 }
 0x556   :  { %v589_v7 = vpop.f32.mrb[4].mxu1 }
 0x557   :  { %v593_v25 = vadd.f32 %v589_v7, %v519_v0  ;;  %v918_v10 = vpop.f32.mrb[5].mxu1 }
 0x559   :  { %1028 = vtanh.f32 %v593_v25 }
 0x563   :  { %v1029_v26 = vpop.eup %1028 }
 0x564   :  { %928 = vmatmul.mubr.msk.f32.vlgmr.msra.gmra.mrb[6].mxu0 %vm54_vm1, %v1029_v26  ;;  %v595_v27 = vmul.f32 %v1029_v26, %v1153_v24 }
 0x566   :  { %v596_v28 = vsel %vm135_vm2, %v595_v27, 0.0 }
 0x567   :  { %597 = vadd.xlane.f32.xlu1 %v596_v28 }
 0x5f4   :  { %v598_v39 = vpop.xlane.xlu1 %597 }
 0x5f5   :  { %v599_v17 = vadd.f32 %v1168_v34, %v598_v39 }
 0x637   :  { %v681_v31 = vpop.f32.mrb[6].mxu0 }
 0x638   :  { %v685_v32 = vadd.f32 %v681_v31, %v611_v30  ;;  %v929_v35 = vpop.f32.mrb[7].mxu0 }
 0x63a   :  { %1030 = vtanh.f32 %v685_v32 }
 0x644   :  { %v1031_v36 = vpop.eup %1030 }
 0x645   :  { %939 = vmatmul.mubr.msk.f32.vlgmr.msra.gmra.mrb[6].mxu1 %vm54_vm1, %v1031_v36  ;;  %v687_v37 = vmul.f32 %v1031_v36, %v1153_v24 }
 0x647   :  { %v688_v38 = vsel %vm135_vm2, %v687_v37, 0.0 }
 0x648   :  { %689 = vadd.xlane.f32.xlu1 %v688_v38 }
 0x6d5   :  { %v690_v40 = vpop.xlane.xlu1 %689 }
 0x6d6   :  { %v691_v41 = vadd.f32 %v1168_v34, %v690_v40 }
 0x6d8   :  { %693 = vrot.lane.b32.xlu0 %v691_v41, %s1075_s13 }
 0x718   :  { %v773_v43 = vpop.f32.mrb[6].mxu1 }
 0x719   :  { %v777_v44 = vadd.f32 %v773_v43, %v703_v42  ;;  %v940_v45 = vpop.f32.mrb[7].mxu1 }
 0x71b   :  { %1032 = vtanh.f32 %v777_v44 }
 0x725   :  { %v1033_v46 = vpop.eup %1032 }
 0x726   :  { %791 = vrot.lane.b32.xlu0 %v1033_v46, %s1060_s23  ;;  %v779_v48 = vmul.f32 %v1033_v46, %v1153_v24 }
 0x728   :  { %v780_v49 = vsel %vm135_vm2, %v779_v48, 0.0 }
 0x729   :  { %781 = vadd.xlane.f32.xlu1 %v780_v49 }
 0x73a   :  { %509 = vrot.lane.b32.xlu1 %v507_v50, %s1076_s14 }
 0x73e   :  { %601 = vrot.lane.b32.xlu1 %v599_v17, %s1077_s15 }
 0x74a   :  { %v694_v52 = vpop.permute.xlu0 %693 }
 0x798   :  { %v792_v53 = vpop.permute.xlu0 %791 }
 0x7b6   :  { %v782_v19 = vpop.xlane.xlu1 %781 }
 0x7b7   :  { %v783_v47 = vadd.f32 %v1168_v34, %v782_v19 }
 0x7b9   :  { %785 = vrot.lane.b32.xlu1 %v783_v47, %s1078_s16 }
 0x7ba   :  { %v510_v51 = vpop.permute.xlu1 %509 }
 0x7bb   :  { %513 = vst.msk [vmem:[%s1273_s3] sm:$0x3] %vm512_vm7, %v510_v51 }
 0x7be   :  { %v602_v24 = vpop.permute.xlu1 %601 }
 0x7bf   :  { %605 = vst.msk [vmem:[%s1273_s3] sm:$0x3] %vm604_vm8, %v602_v24 }
 0x7c0   :  { %697 = vst.msk [vmem:[%s1273_s3] sm:$0x3] %vm696_vm9, %v694_v52 }
 0x82b   :  { %v786_v34 = vpop.permute.xlu1 %785 }
 0x82c   :  { %789 = vst.msk [vmem:[%s1273_s3] sm:$0x3] %vm788_vm10, %v786_v34 }
 0x82d   :  { %795 = vst.msk [vmem:[%s1273_s3] sm:$0x3] %vm794_vm11, %v792_v53 }
 0x82e   :  { %800 = vsyncpa [#allocation3], 1 }

</bundles_post_ra>
